<compile_context>
chip_gen: v7x
topology: tpu7x:2x2x1
jax: 0.10.0
libtpu: 0.0.40
codegen_flags: <defaults>
</compile_context>

<pallas_src>
import functools

import jax
import jax.numpy as jnp
from jax.experimental import pallas as pl
from jax.experimental.pallas import tpu as pltpu


def _round_up(n, m):
    return ((n + m - 1) // m) * m


def _pad2d(a, rows, cols):
    return jnp.pad(a, ((0, rows - a.shape[0]), (0, cols - a.shape[1])))


# ----------------------------- fused Pallas kernel ---------------------------
def fused_reward_kernel(x_ref, wpool_ref, w0_ref, b0_ref, w1_ref, w2_ref,
                        out_ref, *, compute_dtype):
    """Fused shared_net stand-in + reward_head MLP (4 chained MXU matmuls).

    x_ref    : (TB, C*H*W) f32  observation tile (spatial+channel flattened)
    wpool_ref: (C*H*W, Fp) cd   mean-pool + projection folded into one weight
    w0_ref   : (Fp, H0p)   cd   reward_linear_0 weight (zero-padded lanes)
    b0_ref   : (1,  H0p)   f32  reward_linear_0 bias   (zero-padded)
    w1_ref   : (H0p,H1p)   cd   reward_linear_1 weight (bias=False)
    w2_ref   : (H1p,H2p)   cd   reward_linear_2 weight (bias=False, final)
    out_ref  : (TB, H2p)   f32  lane-dense output; column 0 is the reward
    """
    cd = compute_dtype
    # shared_net stand-in: (mean-pool + projection) as one matmul, then tanh.
    # Pool scale (1/HW) is folded into wpool offline. forward() uses no_grad,
    # which is moot for a forward-only kernel.
    state = jnp.tanh(jnp.dot(x_ref[...].astype(cd), wpool_ref[...],
                             preferred_element_type=jnp.float32))          # (TB, Fp)
    # reward head: Linear+bias -> Tanh -> Linear -> Tanh -> Linear
    h = jnp.tanh(jnp.dot(state.astype(cd), w0_ref[...],
                         preferred_element_type=jnp.float32) + b0_ref[...])
    h = jnp.tanh(jnp.dot(h.astype(cd), w1_ref[...],
                         preferred_element_type=jnp.float32))
    out_ref[...] = jnp.dot(h.astype(cd), w2_ref[...],
                           preferred_element_type=jnp.float32).astype(out_ref.dtype)


# ------------------------------- wrapper --------------------------------------
@functools.partial(jax.jit, static_argnames=("out_features", "tile_b"))
def urban_reward_forward(x, w_pool_p, w0_p, b0_p, w1_p, w2_p, *,
                         out_features, tile_b=256):
    B, C, H, W = x.shape
    CHW = C * H * W
    x2 = x.reshape(B, CHW)                   # contiguous -> free metadata reshape
    Fp, H0p = w0_p.shape
    H1p = w1_p.shape[1]
    H2p = w2_p.shape[1]
    compute_dtype = w0_p.dtype
    kernel = functools.partial(fused_reward_kernel, compute_dtype=compute_dtype)

    wbytes = int((w_pool_p.size + w0_p.size + w1_p.size + w2_p.size)
                 * jnp.dtype(compute_dtype).itemsize)
    cost = pl.CostEstimate(
        flops=int(2 * B * (CHW * Fp + Fp * H0p + H0p * H1p + H1p * H2p)),
        transcendentals=int(B * (Fp + H0p + H1p)),
        bytes_accessed=int(x2.size * 4 + wbytes + b0_p.size * 4 + B * H2p * 4),
    )

    if B <= tile_b:
        # whole problem fits one program: everything VMEM-resident, no grid
        out = pl.pallas_call(
            kernel,
            out_shape=jax.ShapeDtypeStruct((B, H2p), jnp.float32),
            in_specs=[pl.BlockSpec(memory_space=pltpu.MemorySpace.VMEM)] * 6,
            out_specs=pl.BlockSpec(memory_space=pltpu.MemorySpace.VMEM),
            cost_estimate=cost,
        )(x2, w_pool_p, w0_p, b0_p, w1_p, w2_p)
    else:
        # batch grid: activation tiles streamed (double-buffered), weights pinned
        B_pad = _round_up(B, tile_b)
        if B_pad != B:
            x2 = jnp.pad(x2, ((0, B_pad - B), (0, 0)))
        out = pl.pallas_call(
            kernel,
            out_shape=jax.ShapeDtypeStruct((B_pad, H2p), jnp.float32),
            grid=(B_pad // tile_b,),
            in_specs=[
                pl.BlockSpec((tile_b, CHW), lambda i: (i, 0)),
                pl.BlockSpec(w_pool_p.shape, lambda i: (0, 0)),   # resident
                pl.BlockSpec(w0_p.shape, lambda i: (0, 0)),       # resident
                pl.BlockSpec(b0_p.shape, lambda i: (0, 0)),       # resident
                pl.BlockSpec(w1_p.shape, lambda i: (0, 0)),       # resident
                pl.BlockSpec(w2_p.shape, lambda i: (0, 0)),       # resident
            ],
            out_specs=pl.BlockSpec((tile_b, H2p), lambda i: (i, 0)),
            compiler_params=pltpu.CompilerParams(
                dimension_semantics=("parallel",)),
            cost_estimate=cost,
        )(x2, w_pool_p, w0_p, b0_p, w1_p, w2_p)
        out = out[:B]
    return out[:, :out_features]


# ------------------------------- module wrapper -------------------------------
class UrbanPlanningRewardPallas:
    """Pallas port of UrbanPlanningReward.

    TODO(synk): the real shared_net is an external module not defined in the
    spec; this deterministic stand-in mean-pools the NCHW observation and
    projects+tanh's it to a state vector of size output_policy_land_use_size
    (the other five shared_net outputs, incl. `stage`, are unused by forward()).
    """

    LANE = 128

    def __init__(self, input_size, hidden_size, in_channels, key):
        # hidden_size mirrors cfg['reward_head_hidden_size'] (3 layers here):
        #   Linear(input_size, h0) + bias -> Tanh -> Linear(h0,h1,no bias)
        #   -> Tanh -> Linear(h1,h2,no bias)
        assert len(hidden_size) == 3, "this synthetic config uses 3 layers"
        k0, k1, k2, k3, k4 = jax.random.split(key, 5)
        s = 0.1
        # unpadded f32 params (torch Linear weights stored transposed: (in,out))
        self.w_proj = s * jax.random.normal(k0, (in_channels, input_size), jnp.float32)
        self.w0 = s * jax.random.normal(k1, (input_size, hidden_size[0]), jnp.float32)
        self.b0 = s * jax.random.normal(k2, (1, hidden_size[0]), jnp.float32)
        self.w1 = s * jax.random.normal(k3, (hidden_size[0], hidden_size[1]), jnp.float32)
        self.w2 = s * jax.random.normal(k4, (hidden_size[1], hidden_size[2]), jnp.float32)
        self.out_features = hidden_size[-1]

        # lane-dense, zero-padded copies for the kernel (built once, offline)
        Fp = _round_up(input_size, self.LANE)
        H0p = _round_up(hidden_size[0], self.LANE)
        H1p = _round_up(hidden_size[1], self.LANE)
        H2p = _round_up(hidden_size[2], self.LANE)
        self.w_proj_p = _pad2d(self.w_proj, in_channels, Fp)     # (C, Fp) f32
        self.w0_p = _pad2d(self.w0, Fp, H0p)
        self.b0_p = _pad2d(self.b0, 1, H0p)          # bias stays f32 in-kernel
        self.w1_p = _pad2d(self.w1, H0p, H1p)
        self.w2_p = _pad2d(self.w2, H1p, H2p)
        self._pool_cache = {}                        # (HW, dtype) -> folded weight

    def _pool_weight(self, hw, cd):
        """Mean-pool + projection folded into one (C*HW, Fp) weight (cached)."""
        key = (int(hw), jnp.dtype(cd).name)
        if key not in self._pool_cache:
            w = jnp.repeat(self.w_proj_p * (1.0 / hw), hw, axis=0)   # row c*HW+s -> w_proj[c]/HW
            self._pool_cache[key] = w.astype(cd)
        return self._pool_cache[key]

    def __call__(self, x, compute_dtype=jnp.float32, tile_b=256):
        cd = jnp.dtype(compute_dtype)
        _, _, H, W = x.shape
        return urban_reward_forward(
            x,
            self._pool_weight(H * W, cd),
            self.w0_p.astype(cd),
            self.b0_p,                     # bias-add / tanh stay f32 (VPU/EUP)
            self.w1_p.astype(cd),
            self.w2_p.astype(cd),
            out_features=self.out_features,
            tile_b=tile_b,
        )


# ------------------------------- reference -----------------------------------
def reference_forward(model, x):
    pooled = jnp.mean(x, axis=(2, 3))
    state = jax.lax.stop_gradient(jnp.tanh(pooled @ model.w_proj))
    h = jnp.tanh(state @ model.w0 + model.b0)
    h = jnp.tanh(h @ model.w1)
    return h @ model.w2


if __name__ == "__main__":
    key = jax.random.PRNGKey(0)
    k_x, k_p, k_xb = jax.random.split(key, 3)

    # small shapes consistent with the module
    B, C, H, W = 2, 4, 16, 16
    input_size = 64                  # shared_net.output_policy_land_use_size
    hidden_size = [32, 32, 1]        # cfg['reward_head_hidden_size']

    model = UrbanPlanningRewardPallas(input_size, hidden_size, C, k_p)
    x = jax.random.normal(k_x, (B, C, H, W), jnp.float32)

    # 1) fused single-kernel path, f32 MXU inputs (matches f32 reference tightly)
    reward = jax.block_until_ready(model(x))
    ref = reference_forward(model, x)
    assert reward.shape == (B, hidden_size[-1])
    assert jnp.allclose(reward, ref, atol=2e-5, rtol=1e-4), "f32 mismatch vs reference"

    # 2) bf16 MXU inputs / f32 accumulation (native MXU dtype on v5e/v6e/v7x)
    reward_bf16 = jax.block_until_ready(model(x, compute_dtype=jnp.bfloat16))
    assert jnp.allclose(reward_bf16, ref, atol=1e-2, rtol=5e-2), "bf16 mismatch vs reference"

    # 3) large-batch path: grid over B, weights VMEM-resident, parallel semantics
    Bb = 300                         # non-multiple of tile -> exercises pad+slice
    xb = jax.random.normal(k_xb, (Bb, C, H, W), jnp.float32)
    reward_big = jax.block_until_ready(model(xb, tile_b=256))
    ref_big = reference_forward(model, xb)
    assert reward_big.shape == (Bb, hidden_size[-1])
    assert jnp.allclose(reward_big, ref_big, atol=2e-5, rtol=1e-4), "grid-path mismatch"

    print("KERNEL_OK")
</pallas_src>

<mosaic_0001>
module attributes {stable_mosaic.version = 11 : i64} {
  func.func @fused_reward_kernel(%arg0: memref<2x1024xf32, #tpu.memory_space<vmem>>, %arg1: memref<1024x128xf32, #tpu.memory_space<vmem>>, %arg2: memref<128x128xf32, #tpu.memory_space<vmem>>, %arg3: memref<1x128xf32, #tpu.memory_space<vmem>>, %arg4: memref<128x128xf32, #tpu.memory_space<vmem>>, %arg5: memref<128x128xf32, #tpu.memory_space<vmem>>, %arg6: memref<2x128xf32, #tpu.memory_space<vmem>>) attributes {dimension_semantics = [], scalar_prefetch = 0 : i64, scratch_operands = 0 : i64, tpu.core_type = #tpu.core_type<tc>} {
    %c0 = arith.constant 0 : index
    %c0_0 = arith.constant 0 : index
    %0 = vector.load %arg0[%c0, %c0_0] : memref<2x1024xf32, #tpu.memory_space<vmem>>, vector<2x1024xf32>
    %c0_1 = arith.constant 0 : index
    %c0_2 = arith.constant 0 : index
    %1 = vector.load %arg1[%c0_1, %c0_2] : memref<1024x128xf32, #tpu.memory_space<vmem>>, vector<1024x128xf32>
    %cst = arith.constant dense<0.000000e+00> : vector<2x128xf32>
    %2 = tpu.matmul %0, %1, %cst {dimension_numbers = #tpu.dot_dimension_numbers<[1], [0], [0], [1], [0, 0, 1, 1], [], []>} : vector<2x1024xf32>, vector<1024x128xf32>, vector<2x128xf32> -> vector<2x128xf32>
    %3 = math.tanh %2 : vector<2x128xf32>
    %c0_3 = arith.constant 0 : index
    %c0_4 = arith.constant 0 : index
    %4 = vector.load %arg2[%c0_3, %c0_4] : memref<128x128xf32, #tpu.memory_space<vmem>>, vector<128x128xf32>
    %cst_5 = arith.constant dense<0.000000e+00> : vector<2x128xf32>
    %5 = tpu.matmul %3, %4, %cst_5 {dimension_numbers = #tpu.dot_dimension_numbers<[1], [0], [0], [1], [0, 0, 1, 1], [], []>} : vector<2x128xf32>, vector<128x128xf32>, vector<2x128xf32> -> vector<2x128xf32>
    %c0_6 = arith.constant 0 : index
    %c0_7 = arith.constant 0 : index
    %6 = vector.load %arg3[%c0_6, %c0_7] : memref<1x128xf32, #tpu.memory_space<vmem>>, vector<1x128xf32>
    %7 = vector.broadcast %6 : vector<1x128xf32> to vector<2x128xf32>
    %8 = arith.addf %5, %7 : vector<2x128xf32>
    %9 = math.tanh %8 : vector<2x128xf32>
    %c0_8 = arith.constant 0 : index
    %c0_9 = arith.constant 0 : index
    %10 = vector.load %arg4[%c0_8, %c0_9] : memref<128x128xf32, #tpu.memory_space<vmem>>, vector<128x128xf32>
    %cst_10 = arith.constant dense<0.000000e+00> : vector<2x128xf32>
    %11 = tpu.matmul %9, %10, %cst_10 {dimension_numbers = #tpu.dot_dimension_numbers<[1], [0], [0], [1], [0, 0, 1, 1], [], []>} : vector<2x128xf32>, vector<128x128xf32>, vector<2x128xf32> -> vector<2x128xf32>
    %12 = math.tanh %11 : vector<2x128xf32>
    %c0_11 = arith.constant 0 : index
    %c0_12 = arith.constant 0 : index
    %13 = vector.load %arg5[%c0_11, %c0_12] : memref<128x128xf32, #tpu.memory_space<vmem>>, vector<128x128xf32>
    %cst_13 = arith.constant dense<0.000000e+00> : vector<2x128xf32>
    %14 = tpu.matmul %12, %13, %cst_13 {dimension_numbers = #tpu.dot_dimension_numbers<[1], [0], [0], [1], [0, 0, 1, 1], [], []>} : vector<2x128xf32>, vector<128x128xf32>, vector<2x128xf32> -> vector<2x128xf32>
    %c0_14 = arith.constant 0 : index
    %c0_15 = arith.constant 0 : index
    %15 = vector.load %arg6[%c0_14, %c0_15] : memref<2x128xf32, #tpu.memory_space<vmem>>, vector<2x128xf32>
    tpu.vector_store %arg6[%c0_14, %c0_15], %14 {strides = array<i32>} : memref<2x128xf32, #tpu.memory_space<vmem>>, vector<2x128xf32>,
    return
  }
}

</mosaic_0001>

<bundles_post_ra>
// kernel: urban_reward_forward.1
= control target key start
LH: loop header
LB: loop body
LE: loop exit
PB: predicated region body
PF: predicated region fallthrough
CT: control target
= control target key end

     0   :  { %11 = vsyncpa [#allocation3], 0  ;;  %s1571_s0 = inlined_call_operand.vmem [shape: f32[2,1024], index: 0, kind: input, shape index: {}]   ;;  %s1572_s1 = inlined_call_operand.hbm [shape: f32[1024,128], index: 1, kind: input, shape index: {}]   ;;  %s1573_s2 = inlined_call_operand.vmem [shape: f32[128,128], index: 2, kind: input, shape index: {}]   ;;  %s1574_s3 = inlined_call_operand.vmem [shape: f32[1,128], index: 3, kind: input, shape index: {}]   ;;  %s1575_s4 = inlined_call_operand.hbm [shape: f32[128,128], index: 4, kind: input, shape index: {}]   ;;  %s1576_s5 = inlined_call_operand.hbm [shape: f32[128,128], index: 5, kind: input, shape index: {}]   ;;  %s1577_s6 = inlined_call_operand.vmem [shape: f32[2,128], index: 6, kind: output, shape index: {}]  }
   0x1   :  { %12 = vsyncpa [#allocation5], 0  ;;  %s1377_s21 = smov [#allocation4]   ;;  %s1378_s23 = smov [#allocation2]  }
   0x2   :  { %s36_s22 = sshll.u32 %s1377_s21, 4  ;;  %s20_s24 = sshll.u32 %s1378_s23, 4  ;;  %s37_s22 = int_to_ptr.vmem [resolvable:$true] %s36_s22  ;;  %s1421_s24 = int_to_ptr.vmem [resolvable:$true] %s20_s24 }
   0x3   :  { %s1307_s27 = scalar_lea.hbm %s1575_s4, 2048 }
   0x4   :  { %p1308_p0 = scmp.ne.s32.totalorder %s1575_s4, %s1307_s27  ;;  %p1311_p1 = scmp.lt.u32.totalorder %s1307_s27, %s1575_s4 }
   0x6   :  { %p1313_p2 = pnand %p1311_p1, %p1308_p0 }
   0x8   :  { %1316 = shalt.err (!%p1313_p2)
}
   0x9   :  { %s1317_s8 = scalar_lea.vmem %s37_s22, 2048  ;;  %p1322_p4 = scmp.lt.s32.totalorder %s37_s22, %s37_s22 }
   0xa   :  { %p1318_p3 = scmp.ne.s32.totalorder %s37_s22, %s1317_s8  ;;  %p1323_p5 = scmp.lt.s32.totalorder %s1317_s8, %s1317_s8 }
   0xc   :  { %p1324_p6 = por %p1323_p5, %p1322_p4 }
   0xe   :  { %p1325_p7 = pnand %p1324_p6, %p1318_p3 }
  0x10   :  { %1328 = shalt.err (!%p1325_p7)
}
  0x11   :  { %s1379_s9 = smov 128   ;;  %s1380_s10 = smov 8  }
  0x12   :  { %42 = dma.hbm_to_vmem [thread:$0]  %s1575_s4, 2048, %s37_s22, [#allocation5], %s1379_s9, %s1379_s9, %s1380_s10  }
  0x13   :  { %s1329_s15 = scalar_lea.hbm %s1572_s1, 16384 }
  0x14   :  { %p1330_p8 = scmp.ne.s32.totalorder %s1572_s1, %s1329_s15  ;;  %p1333_p9 = scmp.lt.u32.totalorder %s1329_s15, %s1572_s1 }
  0x16   :  { %p1335_p10 = pnand %p1333_p9, %p1330_p8 }
  0x18   :  { %1338 = shalt.err (!%p1335_p10)
}
  0x19   :  { %s1339_s20 = scalar_lea.vmem %s1421_s24, 16384  ;;  %p1344_p12 = scmp.lt.s32.totalorder %s1421_s24, %s1421_s24 }
  0x1a   :  { %p1340_p11 = scmp.ne.s32.totalorder %s1421_s24, %s1339_s20  ;;  %p1345_p13 = scmp.lt.s32.totalorder %s1339_s20, %s1339_s20 }
  0x1c   :  { %p1346_p0 = por %p1345_p13, %p1344_p12 }
  0x1e   :  { %p1347_p1 = pnand %p1346_p0, %p1340_p11 }
  0x20   :  { %1350 = shalt.err (!%p1347_p1)
}
  0x21   :  { %26 = dma.hbm_to_vmem [thread:$0]  %s1572_s1, 16384, %s1421_s24, [#allocation3], %s1379_s9, %s1379_s9, %s1380_s10  }
  0x22   :  { %s1381_s22 = smov [#allocation6]   ;;  %s1351_s27 = scalar_lea.hbm %s1576_s5, 2048 }
  0x23   :  { %s48_s23 = sshll.u32 %s1381_s22, 4  ;;  %p1352_p2 = scmp.ne.s32.totalorder %s1576_s5, %s1351_s27  ;;  %s49_s23 = int_to_ptr.vmem [resolvable:$true] %s48_s23 }
  0x24   :  { %p1355_p3 = scmp.lt.u32.totalorder %s1351_s27, %s1576_s5 }
  0x26   :  { %p1357_p4 = pnand %p1355_p3, %p1352_p2 }
  0x28   :  { %1360 = shalt.err (!%p1357_p4)
}
  0x29   :  { %s1361_s8 = scalar_lea.vmem %s49_s23, 2048  ;;  %p1366_p6 = scmp.lt.s32.totalorder %s49_s23, %s49_s23 }
  0x2a   :  { %p1362_p5 = scmp.ne.s32.totalorder %s49_s23, %s1361_s8  ;;  %p1367_p7 = scmp.lt.s32.totalorder %s1361_s8, %s1361_s8 }
  0x2c   :  { %p1368_p8 = por %p1367_p7, %p1366_p6 }
  0x2e   :  { %p1369_p9 = pnand %p1368_p8, %p1362_p5 }
  0x30   :  { %1372 = shalt.err (!%p1369_p9)
}
  0x31   :  { %54 = dma.hbm_to_vmem [thread:$0]  %s1576_s5, 2048, %s49_s23, [#allocation5], %s1379_s9, %s1379_s9, %s1380_s10  }
  0x32   :  { %1373 = dma.done.wait [#allocation3], 16384  }
  0x33   :  { %1374 = vsyncadd [#allocation3], 4294950912 }
  0x34   :  { %1375 = dma.done.wait [#allocation5], 4096  }
  0x35   :  { %1376 = vsyncadd [#allocation5], 4294963200  ;;  %v82_v0 = vld [vmem:[#allocation2 + $0x80] sm:$0xff]  ;;  %v83_v1 = vld [vmem:[#allocation2 + $0x88] sm:$0xff]  ;;  %v1382_v47 = vmov 1983009808   ;;  %v200_v49 = vlaneseq }
  0x36   :  { %v114_v2 = vld [vmem:[#allocation2 + $0x180] sm:$0xff]  ;;  %v1090_v3 = vpack.c.bf16 %v83_v1, %v82_v0  ;;  %v115_v4 = vld [vmem:[#allocation2 + $0x188] sm:$0xff]  ;;  %v84_v11 = vld [vmem:[#allocation2 + $0x90] sm:$0xff]  ;;  %v198_v48 = vunpack.c.l.s4 %v1382_v47  ;;  %vm1384_vm0 = vmmov 0  }
  0x37   :  { %v66_v5 = vld [vmem:[#allocation2] sm:$0xff]  ;;  %v67_v6 = vld [vmem:[#allocation2 + $0x8] sm:$0xff]  ;;  %v1122_v7 = vpack.c.bf16 %v115_v4, %v114_v2  ;;  %v85_v13 = vld [vmem:[#allocation2 + $0x98] sm:$0xff]  ;;  %v201_v0 = vshrl.u32 %v200_v49, 7 }
  0x38   :  { %v1092_v8 = vpack.c.bf16 %v67_v6, %v66_v5  ;;  %v98_v9 = vld [vmem:[#allocation2 + $0x100] sm:$0xff]  ;;  %v99_v10 = vld [vmem:[#allocation2 + $0x108] sm:$0xff]  ;;  %1091 = vmatprep.subr.bf16.mxu0 %v1090_v3  ;;  %v116_v14 = vld [vmem:[#allocation2 + $0x190] sm:$0xff]  ;;  %v1094_v16 = vpack.c.bf16 %v85_v13, %v84_v11  ;;  %v199_v63 = vunpack.c.0.s8 %v198_v48 }
  0x39   :  { %v1124_v12 = vpack.c.bf16 %v99_v10, %v98_v9  ;;  %v117_v15 = vld [vmem:[#allocation2 + $0x198] sm:$0xff]  ;;  %1123 = vmatprep.subr.bf16.mxu1 %v1122_v7  ;;  %v68_v18 = vld [vmem:[#allocation2 + $0x10] sm:$0xff]  ;;  %v86_v23 = vld [vmem:[#allocation2 + $0xa0] sm:$0xff] }
  0x3a   :  { %1093 = vmatpush3.bf16.msra.mxu0 %v1092_v8  ;;  %v1126_v17 = vpack.c.bf16 %v117_v15, %v116_v14  ;;  %v69_v19 = vld [vmem:[#allocation2 + $0x18] sm:$0xff]  ;;  %v100_v20 = vld [vmem:[#allocation2 + $0x110] sm:$0xff]  ;;  %v87_v24 = vld [vmem:[#allocation2 + $0xa8] sm:$0xff]  ;;  %v1473_v13 = vsub.s32 %v199_v63, %v201_v0 }
  0x3b   :  { %1125 = vmatpush3.bf16.msra.mxu1 %v1124_v12  ;;  %v1096_v21 = vpack.c.bf16 %v69_v19, %v68_v18  ;;  %v101_v22 = vld [vmem:[#allocation2 + $0x118] sm:$0xff]  ;;  %1095 = vmatprep.subr.bf16.mxu0 %v1094_v16  ;;  %v1098_v26 = vpack.c.bf16 %v87_v24, %v86_v23  ;;  %v118_v27 = vld [vmem:[#allocation2 + $0x1a0] sm:$0xff]  ;;  %v119_v28 = vld [vmem:[#allocation2 + $0x1a8] sm:$0xff] }
  0x3c   :  { %1127 = vmatprep.subr.bf16.mxu1 %v1126_v17  ;;  %v1128_v25 = vpack.c.bf16 %v101_v22, %v100_v20  ;;  %v70_v29 = vld [vmem:[#allocation2 + $0x20] sm:$0xff]  ;;  %v1130_v30 = vpack.c.bf16 %v119_v28, %v118_v27  ;;  %v71_v31 = vld [vmem:[#allocation2 + $0x28] sm:$0xff]  ;;  %v88_v35 = vld [vmem:[#allocation2 + $0xb0] sm:$0xff] }
  0x3d   :  { %v102_v32 = vld [vmem:[#allocation2 + $0x120] sm:$0xff]  ;;  %v103_v33 = vld [vmem:[#allocation2 + $0x128] sm:$0xff]  ;;  %v1100_v34 = vpack.c.bf16 %v71_v31, %v70_v29  ;;  %v89_v36 = vld [vmem:[#allocation2 + $0xb8] sm:$0xff] }
  0x3e   :  { %1097 = vmatpush3.bf16.msra.mxu0 %v1096_v21  ;;  %v120_v37 = vld [vmem:[#allocation2 + $0x1b0] sm:$0xff]  ;;  %v1132_v38 = vpack.c.bf16 %v103_v33, %v102_v32  ;;  %v1102_v39 = vpack.c.bf16 %v89_v36, %v88_v35  ;;  %v121_v40 = vld [vmem:[#allocation2 + $0x1b8] sm:$0xff]  ;;  %v90_v46 = vld [vmem:[#allocation2 + $0xc0] sm:$0xff] }
  0x3f   :  { %1129 = vmatpush3.bf16.msra.mxu1 %v1128_v25  ;;  %1099 = vmatprep.subr.bf16.mxu0 %v1098_v26  ;;  %v72_v41 = vld [vmem:[#allocation2 + $0x30] sm:$0xff]  ;;  %v73_v42 = vld [vmem:[#allocation2 + $0x38] sm:$0xff]  ;;  %v1134_v43 = vpack.c.bf16 %v121_v40, %v120_v37  ;;  %v91_v50 = vld [vmem:[#allocation2 + $0xc8] sm:$0xff] }
  0x40   :  { %1131 = vmatprep.subr.bf16.mxu1 %v1130_v30  ;;  %v104_v44 = vld [vmem:[#allocation2 + $0x130] sm:$0xff]  ;;  %v105_v45 = vld [vmem:[#allocation2 + $0x138] sm:$0xff]  ;;  %v122_v51 = vld [vmem:[#allocation2 + $0x1c0] sm:$0xff]  ;;  %v1104_v53 = vpack.c.bf16 %v73_v42, %v72_v41  ;;  %v1106_v55 = vpack.c.bf16 %v91_v50, %v90_v46 }
  0x41   :  { %v123_v52 = vld [vmem:[#allocation2 + $0x1c8] sm:$0xff]  ;;  %v1136_v54 = vpack.c.bf16 %v105_v45, %v104_v44  ;;  %v74_v56 = vld [vmem:[#allocation2 + $0x40] sm:$0xff]  ;;  %v92_v61 = vld [vmem:[#allocation2 + $0xd0] sm:$0xff] }
  0x42   :  { %1101 = vmatpush3.bf16.msra.mxu0 %v1100_v34  ;;  %v75_v57 = vld [vmem:[#allocation2 + $0x48] sm:$0xff]  ;;  %v106_v58 = vld [vmem:[#allocation2 + $0x140] sm:$0xff]  ;;  %v1138_v59 = vpack.c.bf16 %v123_v52, %v122_v51  ;;  %v93_v62 = vld [vmem:[#allocation2 + $0xd8] sm:$0xff] }
  0x43   :  { %1133 = vmatpush3.bf16.msra.mxu1 %v1132_v38  ;;  %1103 = vmatprep.subr.bf16.mxu0 %v1102_v39  ;;  %v107_v60 = vld [vmem:[#allocation2 + $0x148] sm:$0xff]  ;;  %v124_v1 = vld [vmem:[#allocation2 + $0x1d0] sm:$0xff]  ;;  %v125_v2 = vld [vmem:[#allocation2 + $0x1d8] sm:$0xff]  ;;  %v1108_v3 = vpack.c.bf16 %v75_v57, %v74_v56  ;;  %v1110_v5 = vpack.c.bf16 %v93_v62, %v92_v61 }
  0x44   :  { %1135 = vmatprep.subr.bf16.mxu1 %v1134_v43  ;;  %v1140_v4 = vpack.c.bf16 %v107_v60, %v106_v58  ;;  %v76_v6 = vld [vmem:[#allocation2 + $0x50] sm:$0xff]  ;;  %v77_v7 = vld [vmem:[#allocation2 + $0x58] sm:$0xff]  ;;  %v1142_v9 = vpack.c.bf16 %v125_v2, %v124_v1  ;;  %v94_v11 = vld [vmem:[#allocation2 + $0xe0] sm:$0xff] }
  0x45   :  { %v108_v8 = vld [vmem:[#allocation2 + $0x150] sm:$0xff]  ;;  %v109_v10 = vld [vmem:[#allocation2 + $0x158] sm:$0xff]  ;;  %v95_v12 = vld [vmem:[#allocation2 + $0xe8] sm:$0xff]  ;;  %v1112_v16 = vpack.c.bf16 %v77_v7, %v76_v6 }
  0x46   :  { %1105 = vmatpush3.bf16.msra.mxu0 %v1104_v53  ;;  %v126_v14 = vld [vmem:[#allocation2 + $0x1e0] sm:$0xff]  ;;  %v127_v15 = vld [vmem:[#allocation2 + $0x1e8] sm:$0xff]  ;;  %v1144_v18 = vpack.c.bf16 %v109_v10, %v108_v8  ;;  %v1114_v19 = vpack.c.bf16 %v95_v12, %v94_v11  ;;  %v96_v25 = vld [vmem:[#allocation2 + $0xf0] sm:$0xff] }
  0x47   :  { %1137 = vmatpush3.bf16.msra.mxu1 %v1136_v54  ;;  %1107 = vmatprep.subr.bf16.mxu0 %v1106_v55  ;;  %v78_v17 = vld [vmem:[#allocation2 + $0x60] sm:$0xff]  ;;  %v79_v20 = vld [vmem:[#allocation2 + $0x68] sm:$0xff]  ;;  %v1146_v23 = vpack.c.bf16 %v127_v15, %v126_v14  ;;  %v97_v26 = vld [vmem:[#allocation2 + $0xf8] sm:$0xff] }
  0x48   :  { %1139 = vmatprep.subr.bf16.mxu1 %v1138_v59  ;;  %v110_v21 = vld [vmem:[#allocation2 + $0x160] sm:$0xff]  ;;  %v111_v24 = vld [vmem:[#allocation2 + $0x168] sm:$0xff]  ;;  %v128_v29 = vld [vmem:[#allocation2 + $0x1f0] sm:$0xff]  ;;  %v1116_v31 = vpack.c.bf16 %v79_v20, %v78_v17  ;;  %v1118_v35 = vpack.c.bf16 %v97_v26, %v96_v25 }
  0x49   :  { %v64_v22 = vld [vmem:[%s1571_s0] sm:$0xff]  ;;  %v129_v30 = vld [vmem:[#allocation2 + $0x1f8] sm:$0xff]  ;;  %v1148_v34 = vpack.c.bf16 %v111_v24, %v110_v21  ;;  %v80_v36 = vld [vmem:[#allocation2 + $0x70] sm:$0xff] }
  0x4a   :  { %1109 = vmatpush3.bf16.msra.mxu0 %v1108_v3  ;;  %v203_v27 = vrot.slane %v64_v22, %v1473_v13  ;;  %v196_v28 = vcombine.high %v64_v22, %v64_v22  ;;  %v81_v37 = vld [vmem:[#allocation2 + $0x78] sm:$0xff]  ;;  %v112_v38 = vld [vmem:[#allocation2 + $0x170] sm:$0xff]  ;;  %v1150_v39 = vpack.c.bf16 %v129_v30, %v128_v29  ;;  %v146_v42 = vld [vmem:[#allocation2 + $0x280] sm:$0xff] }
  0x4b   :  { %1141 = vmatpush3.bf16.msra.mxu1 %v1140_v4  ;;  %1111 = vmatprep.subr.bf16.mxu0 %v1110_v5  ;;  %v113_v40 = vld [vmem:[#allocation2 + $0x178] sm:$0xff]  ;;  %v147_v43 = vld [vmem:[#allocation2 + $0x288] sm:$0xff]  ;;  %v178_v44 = vld [vmem:[#allocation2 + $0x380] sm:$0xff]  ;;  %v1120_v46 = vpack.c.bf16 %v81_v37, %v80_v36 }
  0x4c   :  { %1143 = vmatprep.subr.bf16.mxu1 %v1142_v9  ;;  %v211_v32 = vcombine.high %v203_v27, %v203_v27  ;;  %v210_v33 = vrot.slane %v196_v28, %v1473_v13  ;;  %v179_v45 = vld [vmem:[#allocation2 + $0x388] sm:$0xff]  ;;  %v1152_v47 = vpack.c.bf16 %v113_v40, %v112_v38  ;;  %v1154_v48 = vpack.c.bf16 %v147_v43, %v146_v42  ;;  %v130_v49 = vld [vmem:[#allocation2 + $0x200] sm:$0xff]  ;;  %v148_v54 = vld [vmem:[#allocation2 + $0x290] sm:$0xff] }
  0x4d   :  { %v131_v50 = vld [vmem:[#allocation2 + $0x208] sm:$0xff]  ;;  %v162_v51 = vld [vmem:[#allocation2 + $0x300] sm:$0xff]  ;;  %v1186_v52 = vpack.c.bf16 %v179_v45, %v178_v44  ;;  %v149_v55 = vld [vmem:[#allocation2 + $0x298] sm:$0xff] }
  0x4e   :  { %1113 = vmatpush3.bf16.msra.mxu0 %v1112_v16  ;;  %302 = vmatprep.mubr.f32.mxu0 %v211_v32  ;;  %v212_v41 = vcombine.high %v210_v33, %v210_v33  ;;  %v163_v53 = vld [vmem:[#allocation2 + $0x308] sm:$0xff]  ;;  %v180_v56 = vld [vmem:[#allocation2 + $0x390] sm:$0xff]  ;;  %v181_v57 = vld [vmem:[#allocation2 + $0x398] sm:$0xff]  ;;  %v1156_v58 = vpack.c.bf16 %v131_v50, %v130_v49  ;;  %v1158_v60 = vpack.c.bf16 %v149_v55, %v148_v54 }
  0x4f   :  { %1145 = vmatpush3.bf16.msra.mxu1 %v1144_v18  ;;  %1115 = vmatprep.subr.bf16.mxu0 %v1114_v19  ;;  %v1188_v59 = vpack.c.bf16 %v163_v53, %v162_v51  ;;  %v132_v61 = vld [vmem:[#allocation2 + $0x210] sm:$0xff]  ;;  %v133_v62 = vld [vmem:[#allocation2 + $0x218] sm:$0xff]  ;;  %v1190_v0 = vpack.c.bf16 %v181_v57, %v180_v56  ;;  %v150_v2 = vld [vmem:[#allocation2 + $0x2a0] sm:$0xff] }
  0x50   :  { %1147 = vmatprep.subr.bf16.mxu1 %v1146_v23  ;;  %372 = vmatprep.mubr.f32.mxu1 %v212_v41  ;;  %v164_v63 = vld [vmem:[#allocation2 + $0x310] sm:$0xff]  ;;  %v165_v1 = vld [vmem:[#allocation2 + $0x318] sm:$0xff]  ;;  %v151_v3 = vld [vmem:[#allocation2 + $0x2a8] sm:$0xff]  ;;  %v1160_v6 = vpack.c.bf16 %v133_v62, %v132_v61 }
  0x51   :  { %v182_v4 = vld [vmem:[#allocation2 + $0x3a0] sm:$0xff]  ;;  %v183_v5 = vld [vmem:[#allocation2 + $0x3a8] sm:$0xff]  ;;  %v1192_v7 = vpack.c.bf16 %v165_v1, %v164_v63  ;;  %v1162_v8 = vpack.c.bf16 %v151_v3, %v150_v2  ;;  %v152_v15 = vld [vmem:[#allocation2 + $0x2b0] sm:$0xff] }
  0x52   :  { %1117 = vmatpush3.bf16.msra.mxu0 %v1116_v31  ;;  %v134_v9 = vld [vmem:[#allocation2 + $0x220] sm:$0xff]  ;;  %v135_v10 = vld [vmem:[#allocation2 + $0x228] sm:$0xff]  ;;  %v1194_v12 = vpack.c.bf16 %v183_v5, %v182_v4  ;;  %v153_v16 = vld [vmem:[#allocation2 + $0x2b8] sm:$0xff] }
  0x53   :  { %1149 = vmatpush3.bf16.msra.mxu1 %v1148_v34  ;;  %1119 = vmatprep.subr.bf16.mxu0 %v1118_v35  ;;  %v166_v11 = vld [vmem:[#allocation2 + $0x320] sm:$0xff]  ;;  %v167_v14 = vld [vmem:[#allocation2 + $0x328] sm:$0xff]  ;;  %v184_v17 = vld [vmem:[#allocation2 + $0x3b0] sm:$0xff]  ;;  %v1164_v19 = vpack.c.bf16 %v135_v10, %v134_v9  ;;  %v1166_v21 = vpack.c.bf16 %v153_v16, %v152_v15 }
  0x54   :  { %1151 = vmatprep.subr.bf16.mxu1 %v1150_v39  ;;  %v185_v18 = vld [vmem:[#allocation2 + $0x3b8] sm:$0xff]  ;;  %v1196_v20 = vpack.c.bf16 %v167_v14, %v166_v11  ;;  %v136_v22 = vld [vmem:[#allocation2 + $0x230] sm:$0xff]  ;;  %v155_v28 = vld [vmem:[#allocation2 + $0x2c8] sm:$0xff] }
  0x55   :  { %v137_v23 = vld [vmem:[#allocation2 + $0x238] sm:$0xff]  ;;  %v168_v24 = vld [vmem:[#allocation2 + $0x330] sm:$0xff]  ;;  %v1198_v25 = vpack.c.bf16 %v185_v18, %v184_v17  ;;  %v186_v29 = vld [vmem:[#allocation2 + $0x3c0] sm:$0xff] }
  0x56   :  { %1121 = vmatpush3.bf16.msra.mxu0 %v1120_v46  ;;  %v169_v26 = vld [vmem:[#allocation2 + $0x338] sm:$0xff]  ;;  %v187_v30 = vld [vmem:[#allocation2 + $0x3c8] sm:$0xff]  ;;  %v1168_v32 = vpack.c.bf16 %v137_v23, %v136_v22  ;;  %v138_v37 = vld [vmem:[#allocation2 + $0x240] sm:$0xff]  ;;  %v1383_v22 = vmov 0.0|0.0  }
  0x57   :  { %1153 = vmatpush3.bf16.msra.mxu1 %v1152_v47  ;;  %1155 = vmatprep.subr.bf16.mxu0 %v1154_v48  ;;  %v65_v31 = vld [vmem:[%s1571_s0 + $0x8] sm:$0xff]  ;;  %v1200_v35 = vpack.c.bf16 %v169_v26, %v168_v24  ;;  %v170_v39 = vld [vmem:[#allocation2 + $0x340] sm:$0xff]  ;;  %v1202_v40 = vpack.c.bf16 %v187_v30, %v186_v29  ;;  %v156_v42 = vld [vmem:[#allocation2 + $0x2d0] sm:$0xff] }
  0x58   :  { %1187 = vmatprep.subr.bf16.mxu1 %v1186_v52  ;;  %v213_v34 = vcombine.high %v65_v31, %v65_v31  ;;  %v139_v38 = vld [vmem:[#allocation2 + $0x248] sm:$0xff]  ;;  %v157_v43 = vld [vmem:[#allocation2 + $0x2d8] sm:$0xff]  ;;  %v188_v46 = vld [vmem:[#allocation2 + $0x3d0] sm:$0xff] }
  0x59   :  { %303 = vmatmul.mubr.f32.vlgmr.msra.gmra.mrb[0].mxu0 %v203_v27  ;;  %v154_v27 = vld [vmem:[#allocation2 + $0x2c0] sm:$0xff]  ;;  %v171_v41 = vld [vmem:[#allocation2 + $0x348] sm:$0xff]  ;;  %v189_v47 = vld [vmem:[#allocation2 + $0x3d8] sm:$0xff]  ;;  %v1172_v48 = vpack.c.bf16 %v139_v38, %v138_v37  ;;  %v1174_v51 = vpack.c.bf16 %v157_v43, %v156_v42 }
  0x5a   :  { %373 = vmatmul.mubr.f32.vlgmr.msra.gmra.mrb[0].mxu1 %v210_v33  ;;  %1157 = vmatpush3.bf16.msra.mxu0 %v1156_v58  ;;  %v1484_v33 = vrot.slane %v65_v31, %v1473_v13  ;;  %v1170_v36 = vpack.c.bf16 %v155_v28, %v154_v27  ;;  %v227_v45 = vrot.slane %v213_v34, %v1473_v13  ;;  %v140_v52 = vld [vmem:[#allocation2 + $0x250] sm:$0xff]  ;;  %v141_v53 = vld [vmem:[#allocation2 + $0x258] sm:$0xff]  ;;  %v158_v57 = vld [vmem:[#allocation2 + $0x2e0] sm:$0xff] }
  0x5b   :  { %1189 = vmatpush3.bf16.msra.mxu1 %v1188_v59  ;;  %1159 = vmatprep.subr.bf16.mxu0 %v1158_v60  ;;  %v1204_v50 = vpack.c.bf16 %v171_v41, %v170_v39  ;;  %v172_v54 = vld [vmem:[#allocation2 + $0x350] sm:$0xff]  ;;  %v1206_v55 = vpack.c.bf16 %v189_v47, %v188_v46  ;;  %v173_v56 = vld [vmem:[#allocation2 + $0x358] sm:$0xff]  ;;  %v159_v58 = vld [vmem:[#allocation2 + $0x2e8] sm:$0xff]  ;;  %v1176_v60 = vpack.c.bf16 %v141_v53, %v140_v52  ;;  %v1385_v41 = vmov 0.0  }
  0x5c   :  { %1191 = vmatprep.subr.bf16.mxu1 %v1190_v0  ;;  %v228_v44 = vcombine.high %v1484_v33, %v1484_v33  ;;  %v229_v49 = vcombine.high %v227_v45, %v227_v45  ;;  %v190_v13 = vld [vmem:[#allocation2 + $0x3e0] sm:$0xff]  ;;  %v191_v59 = vld [vmem:[#allocation2 + $0x3e8] sm:$0xff]  ;;  %v1208_v61 = vpack.c.bf16 %v173_v56, %v172_v54  ;;  %v1178_v62 = vpack.c.bf16 %v159_v58, %v158_v57  ;;  %v160_v4 = vld [vmem:[#allocation2 + $0x2f0] sm:$0xff] }
  0x5d   :  { %v142_v63 = vld [vmem:[#allocation2 + $0x260] sm:$0xff]  ;;  %v143_v0 = vld [vmem:[#allocation2 + $0x268] sm:$0xff]  ;;  %v1210_v2 = vpack.c.bf16 %v191_v59, %v190_v13  ;;  %v161_v5 = vld [vmem:[#allocation2 + $0x2f8] sm:$0xff] }
  0x5e   :  { %1161 = vmatpush3.bf16.msra.mxu0 %v1160_v6  ;;  %442 = vmatprep.mubr.f32.mxu0 %v228_v44  ;;  %v174_v1 = vld [vmem:[#allocation2 + $0x360] sm:$0xff]  ;;  %v175_v3 = vld [vmem:[#allocation2 + $0x368] sm:$0xff]  ;;  %v192_v6 = vld [vmem:[#allocation2 + $0x3f0] sm:$0xff]  ;;  %v1182_v10 = vpack.c.bf16 %v161_v5, %v160_v4 }
  0x5f   :  { %1193 = vmatpush3.bf16.msra.mxu1 %v1192_v7  ;;  %1163 = vmatprep.subr.bf16.mxu0 %v1162_v8  ;;  %v193_v7 = vld [vmem:[#allocation2 + $0x3f8] sm:$0xff]  ;;  %v1180_v8 = vpack.c.bf16 %v143_v0, %v142_v63  ;;  %v1212_v9 = vpack.c.bf16 %v175_v3, %v174_v1  ;;  %v144_v11 = vld [vmem:[#allocation2 + $0x270] sm:$0xff]  ;;  %v523_v26 = vld [vmem:[%s1573_s2 + $0x20] sm:$0xff] }
  0x60   :  { %1195 = vmatprep.subr.bf16.mxu1 %v1194_v12  ;;  %512 = vmatprep.mubr.f32.mxu1 %v229_v49  ;;  %v145_v12 = vld [vmem:[#allocation2 + $0x278] sm:$0xff]  ;;  %v1214_v14 = vpack.c.bf16 %v193_v7, %v192_v6  ;;  %v176_v15 = vld [vmem:[#allocation2 + $0x370] sm:$0xff]  ;;  %v524_v27 = vld [vmem:[%s1573_s2 + $0x28] sm:$0xff] }
  0x61   :  { %v177_v16 = vld [vmem:[#allocation2 + $0x378] sm:$0xff]  ;;  %v1184_v17 = vpack.c.bf16 %v145_v12, %v144_v11  ;;  %v1225_v28 = vpack.c.bf16 %v524_v27, %v523_v26  ;;  %v525_v29 = vld [vmem:[%s1573_s2 + $0x30] sm:$0xff]  ;;  %v531_v38 = vld [vmem:[%s1573_s2 + $0x60] sm:$0xff] }
  0x62   :  { %1165 = vmatpush3.bf16.msra.mxu0 %v1164_v19  ;;  %v1216_v18 = vpack.c.bf16 %v177_v16, %v176_v15  ;;  %v519_v19 = vld [vmem:[%s1573_s2] sm:$0xff]  ;;  %v522_v24 = vld [vmem:[%s1573_s2 + $0x18] sm:$0xff]  ;;  %v532_v39 = vld [vmem:[%s1573_s2 + $0x68] sm:$0xff] }
  0x63   :  { %1197 = vmatpush3.bf16.msra.mxu1 %v1196_v20  ;;  %1167 = vmatprep.subr.bf16.mxu0 %v1166_v21  ;;  %v520_v20 = vld [vmem:[%s1573_s2 + $0x8] sm:$0xff]  ;;  %v521_v21 = vld [vmem:[%s1573_s2 + $0x10] sm:$0xff]  ;;  %v526_v30 = vld [vmem:[%s1573_s2 + $0x38] sm:$0xff] }
  0x64   :  { %1199 = vmatprep.subr.bf16.mxu1 %v1198_v25  ;;  %v1219_v23 = vpack.c.bf16 %v520_v20, %v519_v19  ;;  %v1222_v25 = vpack.c.bf16 %v522_v24, %v521_v21  ;;  %v1228_v31 = vpack.c.bf16 %v526_v30, %v525_v29  ;;  %v533_v42 = vld [vmem:[%s1573_s2 + $0x70] sm:$0xff]  ;;  %v534_v43 = vld [vmem:[%s1573_s2 + $0x78] sm:$0xff]  ;;  %v614_v46 = vld [vmem:[#allocation4 + $0x8] sm:$0xff] }
  0x65   :  { %v1240_v44 = vpack.c.bf16 %v534_v43, %v533_v42  ;;  %v615_v47 = vld [vmem:[#allocation4 + $0x10] sm:$0xff]  ;;  %v616_v49 = vld [vmem:[#allocation4 + $0x18] sm:$0xff]  ;;  %v618_v52 = vld [vmem:[#allocation4 + $0x28] sm:$0xff] }
  0x66   :  { %1169 = vmatpush3.bf16.msra.mxu0 %v1168_v32  ;;  %v527_v32 = vld [vmem:[%s1573_s2 + $0x40] sm:$0xff]  ;;  %v619_v54 = vld [vmem:[#allocation4 + $0x30] sm:$0xff]  ;;  %v622_v58 = vld [vmem:[#allocation4 + $0x48] sm:$0xff] }
  0x67   :  { %1201 = vmatpush3.bf16.msra.mxu1 %v1200_v35  ;;  %1171 = vmatprep.subr.bf16.mxu0 %v1170_v36  ;;  %v529_v35 = vld [vmem:[%s1573_s2 + $0x50] sm:$0xff]  ;;  %v530_v36 = vld [vmem:[%s1573_s2 + $0x58] sm:$0xff]  ;;  %v621_v57 = vld [vmem:[#allocation4 + $0x40] sm:$0xff] }
  0x68   :  { %1203 = vmatprep.subr.bf16.mxu1 %v1202_v40  ;;  %v1234_v37 = vpack.c.bf16 %v530_v36, %v529_v35  ;;  %v1237_v40 = vpack.c.bf16 %v532_v39, %v531_v38  ;;  %v1255_v13 = vpack.c.bf16 %v622_v58, %v621_v57  ;;  %v623_v11 = vld [vmem:[#allocation4 + $0x50] sm:$0xff]  ;;  %v624_v12 = vld [vmem:[#allocation4 + $0x58] sm:$0xff]  ;;  %v625_v15 = vld [vmem:[#allocation4 + $0x60] sm:$0xff] }
  0x69   :  { %v626_v16 = vld [vmem:[#allocation4 + $0x68] sm:$0xff]  ;;  %v628_v19 = vld [vmem:[#allocation4 + $0x78] sm:$0xff]  ;;  %v700_v21 = vld [vmem:[#allocation6] sm:$0xff] }
  0x6a   :  { %1173 = vmatpush3.bf16.msra.mxu0 %v1172_v48  ;;  %v702_v24 = vld [vmem:[#allocation6 + $0x10] sm:$0xff]  ;;  %v703_v26 = vld [vmem:[#allocation6 + $0x18] sm:$0xff]  ;;  %v705_v29 = vld [vmem:[#allocation6 + $0x28] sm:$0xff] }
  0x6b   :  { %1205 = vmatpush3.bf16.msra.mxu1 %v1204_v50  ;;  %1175 = vmatprep.subr.bf16.mxu0 %v1174_v51  ;;  %v1246_v50 = vpack.c.bf16 %v616_v49, %v615_v47  ;;  %v617_v51 = vld [vmem:[#allocation4 + $0x20] sm:$0xff]  ;;  %v1270_v27 = vpack.c.bf16 %v703_v26, %v702_v24  ;;  %v709_v35 = vld [vmem:[#allocation6 + $0x48] sm:$0xff]  ;;  %v710_v42 = vld [vmem:[#allocation6 + $0x50] sm:$0xff] }
  0x6c   :  { %1207 = vmatprep.subr.bf16.mxu1 %v1206_v55  ;;  %v1249_v53 = vpack.c.bf16 %v618_v52, %v617_v51  ;;  %v620_v55 = vld [vmem:[#allocation4 + $0x38] sm:$0xff] }
  0x6d   :  { %v1252_v56 = vpack.c.bf16 %v620_v55, %v619_v54  ;;  %v711_v43 = vld [vmem:[#allocation6 + $0x58] sm:$0xff] }
  0x6e   :  { %1177 = vmatpush3.bf16.msra.mxu0 %v1176_v60  ;;  %v715_v49 = vld [vmem:[#allocation6 + $0x78] sm:$0xff] }
  0x6f   :  { %1209 = vmatpush3.bf16.msra.mxu1 %v1208_v61  ;;  %1179 = vmatprep.subr.bf16.mxu0 %v1178_v62 }
  0x70   :  { %1211 = vmatprep.subr.bf16.mxu1 %v1210_v2 }
  0x72   :  { %1181 = vmatpush3.bf16.msra.mxu0 %v1180_v8 }
  0x73   :  { %1213 = vmatpush3.bf16.msra.mxu1 %v1212_v9  ;;  %1183 = vmatprep.subr.bf16.mxu0 %v1182_v10 }
  0x74   :  { %1215 = vmatprep.subr.bf16.mxu1 %v1214_v14  ;;  %v1258_v14 = vpack.c.bf16 %v624_v12, %v623_v11 }
  0x76   :  { %1185 = vmatpush3.bf16.msra.mxu0 %v1184_v17  ;;  %v1261_v17 = vpack.c.bf16 %v626_v16, %v625_v15 }
  0x77   :  { %1217 = vmatpush3.bf16.msra.mxu1 %v1216_v18  ;;  %1218 = vmatprep.subr.bf16.mxu0 %v1383_v22  ;;  %v627_v18 = vld [vmem:[#allocation4 + $0x70] sm:$0xff] }
  0x78   :  { %1242 = vmatprep.subr.bf16.mxu1 %v1383_v22  ;;  %v1264_v20 = vpack.c.bf16 %v628_v19, %v627_v18 }
  0x79   :  { %443 = vmatmul.mubr.f32.vlgmr.msra.gmra.mrb[2].mxu0 %v1484_v33  ;;  %v528_v33 = vld [vmem:[%s1573_s2 + $0x48] sm:$0xff] }
  0x7a   :  { %513 = vmatmul.mubr.f32.vlgmr.msra.gmra.mrb[2].mxu1 %v227_v45  ;;  %1220 = vmatpush3.bf16.msra.mxu0 %v1219_v23  ;;  %v1231_v34 = vpack.c.bf16 %v528_v33, %v527_v32  ;;  %v613_v45 = vld [vmem:[#allocation4] sm:$0xff]  ;;  %v701_v23 = vld [vmem:[#allocation6 + $0x8] sm:$0xff]  ;;  %v707_v32 = vld [vmem:[#allocation6 + $0x38] sm:$0xff] }
  0x7b   :  { %1221 = vmatprep.subr.bf16.mxu0 %v1383_v22  ;;  %1017 = vmatprep.mubr.msk.f32.mxu0 %vm1384_vm0, %v1385_v41  ;;  %v1243_v48 = vpack.c.bf16 %v614_v46, %v613_v45  ;;  %v712_v45 = vld [vmem:[#allocation6 + $0x60] sm:$0xff]  ;;  %v713_v46 = vld [vmem:[#allocation6 + $0x68] sm:$0xff] }
  0x7c   :  { %1052 = vmatprep.mubr.msk.f32.mxu1 %vm1384_vm0, %v1385_v41  ;;  %v1285_v47 = vpack.c.bf16 %v713_v46, %v712_v45 }
  0x7d   :  { %1244 = vmatpush3.bf16.msra.mxu1 %v1243_v48  ;;  %v714_v48 = vld [vmem:[#allocation6 + $0x70] sm:$0xff] }
  0x7e   :  { %1223 = vmatpush3.bf16.msra.mxu0 %v1222_v25  ;;  %1245 = vmatprep.subr.bf16.mxu1 %v1383_v22  ;;  %v1267_v25 = vpack.c.bf16 %v701_v23, %v700_v21 }
  0x7f   :  { %1224 = vmatprep.subr.bf16.mxu0 %v1383_v22 }
  0x81   :  { %1247 = vmatpush3.bf16.msra.mxu1 %v1246_v50  ;;  %v1288_v50 = vpack.c.bf16 %v715_v49, %v714_v48 }
  0x82   :  { %1226 = vmatpush3.bf16.msra.mxu0 %v1225_v28  ;;  %1248 = vmatprep.subr.bf16.mxu1 %v1383_v22  ;;  %v704_v28 = vld [vmem:[#allocation6 + $0x20] sm:$0xff] }
  0x83   :  { %1227 = vmatprep.subr.bf16.mxu0 %v1383_v22  ;;  %v1273_v30 = vpack.c.bf16 %v705_v29, %v704_v28 }
  0x85   :  { %1250 = vmatpush3.bf16.msra.mxu1 %v1249_v53 }
  0x86   :  { %1229 = vmatpush3.bf16.msra.mxu0 %v1228_v31  ;;  %1251 = vmatprep.subr.bf16.mxu1 %v1383_v22  ;;  %v706_v31 = vld [vmem:[#allocation6 + $0x30] sm:$0xff] }
  0x87   :  { %1230 = vmatprep.subr.bf16.mxu0 %v1383_v22  ;;  %v1276_v33 = vpack.c.bf16 %v707_v32, %v706_v31 }
  0x89   :  { %1253 = vmatpush3.bf16.msra.mxu1 %v1252_v56 }
  0x8a   :  { %1232 = vmatpush3.bf16.msra.mxu0 %v1231_v34  ;;  %1254 = vmatprep.subr.bf16.mxu1 %v1383_v22  ;;  %v708_v34 = vld [vmem:[#allocation6 + $0x40] sm:$0xff] }
  0x8b   :  { %1233 = vmatprep.subr.bf16.mxu0 %v1383_v22  ;;  %v1279_v36 = vpack.c.bf16 %v709_v35, %v708_v34 }
  0x8d   :  { %1256 = vmatpush3.bf16.msra.mxu1 %v1255_v13 }
  0x8e   :  { %1235 = vmatpush3.bf16.msra.mxu0 %v1234_v37  ;;  %1257 = vmatprep.subr.bf16.mxu1 %v1383_v22  ;;  %v793_v37 = vld [vmem:[%s1574_s3] ss:$0 sm:$0xff] }
  0x8f   :  { %1236 = vmatprep.subr.bf16.mxu0 %v1383_v22 }
  0x91   :  { %1259 = vmatpush3.bf16.msra.mxu1 %v1258_v14 }
  0x92   :  { %1238 = vmatpush3.bf16.msra.mxu0 %v1237_v40  ;;  %1260 = vmatprep.subr.bf16.mxu1 %v1383_v22 }
  0x93   :  { %1239 = vmatprep.subr.bf16.mxu0 %v1383_v22 }
  0x95   :  { %1262 = vmatpush3.bf16.msra.mxu1 %v1261_v17 }
  0x96   :  { %1241 = vmatpush3.bf16.msra.mxu0 %v1240_v44  ;;  %1263 = vmatprep.subr.bf16.mxu1 %v1383_v22  ;;  %v1282_v44 = vpack.c.bf16 %v711_v43, %v710_v42 }
  0x97   :  { %1266 = vmatprep.subr.bf16.mxu0 %v1383_v22 }
  0x99   :  { %1265 = vmatpush3.bf16.msra.mxu1 %v1264_v20 }
 0x12c   :  { %v826_v59 = vpop.f32.mrb[0].mxu0 }
 0x12d   :  { %v861_v60 = vpop.f32.mrb[0].mxu1  ;;  %v827_v61 = vpop.f32.mrb[1].mxu0 }
 0x12e   :  { %v828_v62 = vadd.f32 %v827_v61, %v826_v59  ;;  %v862_v63 = vpop.f32.mrb[1].mxu1 }
 0x12f   :  { %v863_v0 = vadd.f32 %v862_v63, %v861_v60 }
 0x131   :  { %v375_v1 = vadd.f32 %v863_v0, %v828_v62 }
 0x14c   :  { %v896_v2 = vpop.f32.mrb[2].mxu0 }
 0x14d   :  { %v897_v3 = vpop.f32.mrb[3].mxu0  ;;  %v931_v4 = vpop.f32.mrb[2].mxu1 }
 0x14e   :  { %v898_v5 = vadd.f32 %v897_v3, %v896_v2  ;;  %v932_v6 = vpop.f32.mrb[3].mxu1 }
 0x14f   :  { %v933_v7 = vadd.f32 %v932_v6, %v931_v4 }
 0x150   :  { %v445_v8 = vadd.f32 %v898_v5, %v375_v1 }
 0x152   :  { %v515_v9 = vadd.f32 %v933_v7, %v445_v8 }
 0x154   :  { %1301 = vtanh.f32 %v515_v9 }
 0x15e   :  { %v1302_v10 = vpop.eup %1301 }
 0x15f   :  { %1018 = vmatmul.mubr.f32.vlgmr.msra.gmra.mrb[4].mxu0 %v1302_v10 }
 0x160   :  { %1087 = vmatprep.mubr.msk.f32.mxu0 %vm1384_vm0, %v1385_v41  ;;  %1268 = vmatpush3.bf16.msra.mxu0 %v1267_v25 }
 0x161   :  { %1269 = vmatprep.subr.bf16.mxu0 %v1383_v22 }
 0x164   :  { %1271 = vmatpush3.bf16.msra.mxu0 %v1270_v27 }
 0x165   :  { %1272 = vmatprep.subr.bf16.mxu0 %v1383_v22 }
 0x168   :  { %1274 = vmatpush3.bf16.msra.mxu0 %v1273_v30 }
 0x169   :  { %1275 = vmatprep.subr.bf16.mxu0 %v1383_v22 }
 0x16c   :  { %1277 = vmatpush3.bf16.msra.mxu0 %v1276_v33 }
 0x16d   :  { %1278 = vmatprep.subr.bf16.mxu0 %v1383_v22 }
 0x170   :  { %1280 = vmatpush3.bf16.msra.mxu0 %v1279_v36 }
 0x171   :  { %1281 = vmatprep.subr.bf16.mxu0 %v1383_v22 }
 0x174   :  { %1283 = vmatpush3.bf16.msra.mxu0 %v1282_v44 }
 0x175   :  { %1284 = vmatprep.subr.bf16.mxu0 %v1383_v22 }
 0x178   :  { %1286 = vmatpush3.bf16.msra.mxu0 %v1285_v47 }
 0x179   :  { %1287 = vmatprep.subr.bf16.mxu0 %v1383_v22 }
 0x17c   :  { %1289 = vmatpush3.bf16.msra.mxu0 %v1288_v50 }
 0x232   :  { %v608_v38 = vpop.f32.mrb[4].mxu0 }
 0x233   :  { %v609_v39 = vadd.f32 %v793_v37, %v608_v38  ;;  %v1019_v40 = vpop.f32.mrb[5].mxu0 }
 0x235   :  { %1303 = vtanh.f32 %v609_v39 }
 0x23f   :  { %v1304_v41 = vpop.eup %1303 }
 0x240   :  { %1053 = vmatmul.mubr.f32.vlgmr.msra.gmra.mrb[4].mxu1 %v1304_v41 }
 0x313   :  { %v695_v51 = vpop.f32.mrb[4].mxu1 }
 0x314   :  { %1305 = vtanh.f32 %v695_v51  ;;  %v1054_v52 = vpop.f32.mrb[5].mxu1 }
 0x31e   :  { %v1306_v53 = vpop.eup %1305 }
 0x31f   :  { %1088 = vmatmul.mubr.f32.vlgmr.msra.gmra.mrb[6].mxu0 %v1306_v53 }
 0x3f2   :  { %v782_v54 = vpop.f32.mrb[6].mxu0 }
 0x3f3   :  { %786 = vst [vmem:[%s1577_s6] sm:$0x3] %v782_v54  ;;  %v1089_v55 = vpop.f32.mrb[7].mxu0 }
 0x3f4   :  { %791 = vsyncpa [#allocation3], 1 }
 0x3f5   :  { %792 = vsyncpa [#allocation5], 1 }

</bundles_post_ra>
